<compile_context>
chip_gen: v6e
topology: v6e:2x2x1
jax: 0.10.0
libtpu: 0.0.40
codegen_flags: <defaults>
</compile_context>

<pallas_src>
import functools

import jax
import jax.numpy as jnp
from jax.experimental import pallas as pl
from jax.experimental.pallas import tpu as pltpu


def _round_up(x, m):
    return ((x + m - 1) // m) * m


def _layernorm_f32(x, gamma, beta, eps=1e-5):
    # x: (R, C) f32, gamma/beta: (1, C) f32 — statistics in f32 (v5e-safe).
    mean = jnp.mean(x, axis=-1, keepdims=True)
    var = jnp.mean((x - mean) ** 2, axis=-1, keepdims=True)
    inv = jax.lax.rsqrt(var + eps)
    return (x - mean) * inv * gamma + beta


# ---------------------------------------------------------------------------
# kernels
# ---------------------------------------------------------------------------
def attn_block_kernel(x_ref, g1_ref, bt1_ref,
                      wq_ref, wk_ref, wv_ref, wo_ref, pb_ref,
                      o_ref, xn_ref, acc_ref, *, heads_per_group, head_dim):
    """Grid = (B, H // G).  One (batch, head-group) per step.

    x_ref        : (N, C)        x.dtype  (batch squeezed, resident across groups)
    wq/wk/wv_ref : (HG, C, G*hd) bf16     full weights, resident (constant index map)
    wo_ref       : (HG, G*hd, C) bf16     full out-projection, resident
    o_ref        : (N, C)        x.dtype  written once at the last head group
    xn_ref       : (N, C) bf16 scratch:   LN1(x), computed once per batch element
    acc_ref      : (N, C) f32  scratch:   x + proj_bias + sum_h head partials
    """
    hg = pl.program_id(1)
    bf16 = jnp.bfloat16

    @pl.when(hg == 0)
    def _():
        x = x_ref[...].astype(jnp.float32)
        xn_ref[...] = _layernorm_f32(x, g1_ref[...], bt1_ref[...]).astype(bf16)
        # residual + proj bias, added once per batch element
        acc_ref[...] = x + pb_ref[...]

    xn = xn_ref[...]                                             # (N, C) bf16

    # Grouped-head QKV projections — wide (N,C)@(C,G*hd) dots, scale pre-folded
    # into Wq at pack time, bf16 MXU inputs, f32 accumulation.
    q = jnp.dot(xn, wq_ref[hg], preferred_element_type=jnp.float32).astype(bf16)
    k = jnp.dot(xn, wk_ref[hg], preferred_element_type=jnp.float32).astype(bf16)
    v = jnp.dot(xn, wv_ref[hg], preferred_element_type=jnp.float32).astype(bf16)

    # Per-head score / softmax / PV inside the group (small unrolled loop).
    outs = []
    for g in range(heads_per_group):
        lo, hi = g * head_dim, (g + 1) * head_dim
        qh, kh, vh = q[:, lo:hi], k[:, lo:hi], v[:, lo:hi]
        s = jax.lax.dot_general(qh, kh, (((1,), (1,)), ((), ())),
                                preferred_element_type=jnp.float32)   # (N, N) f32
        s = s - jnp.max(s, axis=-1, keepdims=True)
        p = jnp.exp(s)
        p = p * pl.reciprocal(jnp.sum(p, axis=-1, keepdims=True), approx=True)
        outs.append(jnp.dot(p.astype(bf16), vh,
                            preferred_element_type=jnp.float32))      # (N, hd)
    o_grp = jnp.concatenate(outs, axis=-1).astype(bf16)               # (N, G*hd)

    # Single fused out-projection for the whole group, accumulated into the
    # lane-dense (N, C) f32 scratch — no merge-heads transpose.
    acc_ref[...] += jnp.dot(o_grp, wo_ref[hg],
                            preferred_element_type=jnp.float32)

    @pl.when(hg == pl.num_programs(1) - 1)
    def _():
        o_ref[...] = acc_ref[...].astype(o_ref.dtype)


def mlp_block_kernel(x_ref, g2_ref, bt2_ref,
                     w1_ref, b1_ref, w2_ref, b2_ref,
                     o_ref, xn_ref, acc_ref, *, approx_gelu):
    """Grid = (row_tiles, hidden_tiles).

    x_ref : (TM, C)  x.dtype  rows of x1 (resident across the hidden axis)
    w1_ref: (C, TK)  bf16     fc1 slice (in, out)
    w2_ref: (TK, C)  bf16     fc2 slice (in, out)
    o_ref : (TM, C)  x.dtype  written once at the last hidden tile
    xn_ref: (TM, C)  bf16 scratch: LN2(x1), computed once per row tile
    acc_ref:(TM, C)  f32  scratch: x1 + fc2_bias + sum_k GELU(...)@w2_k
    """
    kh = pl.program_id(1)
    bf16 = jnp.bfloat16

    @pl.when(kh == 0)
    def _():
        x = x_ref[...].astype(jnp.float32)
        xn_ref[...] = _layernorm_f32(x, g2_ref[...], bt2_ref[...]).astype(bf16)
        # residual + fc2 bias, added once per row tile
        acc_ref[...] = x + b2_ref[...]

    h = jnp.dot(xn_ref[...], w1_ref[...],
                preferred_element_type=jnp.float32) + b1_ref[...]     # (TM, TK) f32
    h = jax.nn.gelu(h, approximate=approx_gelu)                       # f32 (v5e-safe)
    acc_ref[...] += jnp.dot(h.astype(bf16), w2_ref[...],
                            preferred_element_type=jnp.float32)       # (TM, C)

    @pl.when(kh == pl.num_programs(1) - 1)
    def _():
        o_ref[...] = acc_ref[...].astype(o_ref.dtype)


# ---------------------------------------------------------------------------
# wrapper
# ---------------------------------------------------------------------------
def block_forward(x, params, num_heads, *, approx_gelu=True):
    B, N, C = x.shape
    H = num_heads
    hd = C // H
    scale = hd ** (-0.5)
    Hdim = params['fc1_w'].shape[0]

    f32, bf16 = jnp.float32, jnp.bfloat16

    # ---- generation-aware knobs --------------------------------------------
    vmem_cap = 128 * 1024 * 1024
    try:
        vmem_cap = int(getattr(pltpu.get_tpu_info(), "vmem_capacity_bytes",
                               vmem_cap) or vmem_cap)
    except Exception:
        pass
    small_vmem = vmem_cap <= 64 * 1024 * 1024          # v7x-class parts
    vmem_limit = (40 if small_vmem else 64) * 1024 * 1024
    tm_target = 512 if small_vmem else 1024

    # head grouping: G*hd-wide QKV / out-proj dots fill the 256-wide MXU
    G = 1
    for cand in (4, 2, 1):
        if H % cand == 0:
            G = cand
            break
    HG = H // G
    Ghd = G * hd

    # ---- one-time weight packing (outside the kernels): (in, out) layout,
    #      head-group split, bf16 MXU inputs, q-scale folded into Wq.
    qkv_w = params['qkv_w']                                     # (3C, C) torch (out,in)

    def grouped_in_out(w_out_in, fold_scale=False):
        w = w_out_in.T                                          # (C_in, C_out)
        if fold_scale:
            w = w * scale
        return w.reshape(C, HG, Ghd).transpose(1, 0, 2).astype(bf16)   # (HG, C, G*hd)

    wq = grouped_in_out(qkv_w[0 * C:1 * C], fold_scale=True)
    wk = grouped_in_out(qkv_w[1 * C:2 * C])
    wv = grouped_in_out(qkv_w[2 * C:3 * C])
    wo = params['proj_w'].T.reshape(HG, Ghd, C).astype(bf16)    # (HG, G*hd, C)
    pb = params['proj_b'].astype(f32).reshape(1, C)

    w1 = params['fc1_w'].T.astype(bf16)                         # (C, Hdim)
    b1 = params['fc1_b'].astype(f32).reshape(1, Hdim)
    w2 = params['fc2_w'].T.astype(bf16)                         # (Hdim, C)
    b2 = params['fc2_b'].astype(f32).reshape(1, C)

    g1 = params['ln1_g'].astype(f32).reshape(1, C)
    bt1 = params['ln1_b'].astype(f32).reshape(1, C)
    g2 = params['ln2_g'].astype(f32).reshape(1, C)
    bt2 = params['ln2_b'].astype(f32).reshape(1, C)

    cparams = pltpu.CompilerParams(
        dimension_semantics=("parallel", "arbitrary"),
        vmem_limit_bytes=vmem_limit,
    )

    # ------------- Call A: x1 = x + Attn(LN1(x)),  grid (B, H//G) ------------
    # Weight BlockSpecs use a constant index_map -> DMA'd once, VMEM-resident.
    x1 = pl.pallas_call(
        functools.partial(attn_block_kernel, heads_per_group=G, head_dim=hd),
        out_shape=jax.ShapeDtypeStruct((B, N, C), x.dtype),
        grid_spec=pltpu.PrefetchScalarGridSpec(
            num_scalar_prefetch=0,
            grid=(B, HG),
            in_specs=[
                pl.BlockSpec((pl.Squeezed(), N, C), lambda b, h: (b, 0, 0)),  # x
                pl.BlockSpec((1, C), lambda b, h: (0, 0)),                    # ln1 gamma
                pl.BlockSpec((1, C), lambda b, h: (0, 0)),                    # ln1 beta
                pl.BlockSpec((HG, C, Ghd), lambda b, h: (0, 0, 0)),           # Wq (resident)
                pl.BlockSpec((HG, C, Ghd), lambda b, h: (0, 0, 0)),           # Wk (resident)
                pl.BlockSpec((HG, C, Ghd), lambda b, h: (0, 0, 0)),           # Wv (resident)
                pl.BlockSpec((HG, Ghd, C), lambda b, h: (0, 0, 0)),           # Wproj (resident)
                pl.BlockSpec((1, C), lambda b, h: (0, 0)),                    # proj bias
            ],
            out_specs=pl.BlockSpec((pl.Squeezed(), N, C), lambda b, h: (b, 0, 0)),
            scratch_shapes=[pltpu.VMEM((N, C), bf16),          # LN1(x) cache
                            pltpu.VMEM((N, C), f32)],          # head accumulator
        ),
        compiler_params=cparams,
    )(x, g1, bt1, wq, wk, wv, wo, pb)

    # ------------- Call B: x2 = x1 + MLP(LN2(x1)), rows + hidden tiled -------
    BN = B * N
    TM = min(tm_target, _round_up(BN, 8))          # explicit row tile, 8-aligned
    BN_pad = _round_up(BN, TM)                     # pad rows so TM always divides
    if Hdim % 512 == 0:
        TK = 512
    elif Hdim % 256 == 0:
        TK = 256
    elif Hdim % 128 == 0:
        TK = 128
    else:
        TK = Hdim

    x1_2d = x1.reshape(BN, C)
    if BN_pad != BN:
        x1_2d = jnp.pad(x1_2d, ((0, BN_pad - BN), (0, 0)))

    x2 = pl.pallas_call(
        functools.partial(mlp_block_kernel, approx_gelu=approx_gelu),
        out_shape=jax.ShapeDtypeStruct((BN_pad, C), x.dtype),
        grid_spec=pltpu.PrefetchScalarGridSpec(
            num_scalar_prefetch=0,
            grid=(BN_pad // TM, Hdim // TK),
            in_specs=[
                pl.BlockSpec((TM, C), lambda r, k: (r, 0)),        # x1 rows
                pl.BlockSpec((1, C), lambda r, k: (0, 0)),         # ln2 gamma
                pl.BlockSpec((1, C), lambda r, k: (0, 0)),         # ln2 beta
                pl.BlockSpec((C, TK), lambda r, k: (0, k)),        # fc1 slice
                pl.BlockSpec((1, TK), lambda r, k: (0, k)),        # fc1 bias slice
                pl.BlockSpec((TK, C), lambda r, k: (k, 0)),        # fc2 slice
                pl.BlockSpec((1, C), lambda r, k: (0, 0)),         # fc2 bias
            ],
            out_specs=pl.BlockSpec((TM, C), lambda r, k: (r, 0)),
            scratch_shapes=[pltpu.VMEM((TM, C), bf16),             # LN2(x1) cache
                            pltpu.VMEM((TM, C), f32)],             # MLP accumulator
        ),
        compiler_params=cparams,
    )(x1_2d, g2, bt2, w1, b1, w2, b2)

    return x2[:BN].reshape(B, N, C).astype(x.dtype)


# ---------------- pure-JAX f32 reference for correctness checking ------------
def block_reference(x, p, num_heads):
    B, N, C = x.shape
    hd = C // num_heads
    scale = hd ** (-0.5)

    def ln(x, g, b, eps=1e-5):
        m = jnp.mean(x, -1, keepdims=True)
        v = jnp.mean((x - m) ** 2, -1, keepdims=True)
        return (x - m) / jnp.sqrt(v + eps) * g + b

    h = ln(x, p['ln1_g'], p['ln1_b'])
    qkv = h @ p['qkv_w'].T
    qkv = qkv.reshape(B, N, 3, num_heads, hd).transpose(2, 0, 3, 1, 4)
    q, k, v = qkv[0] * scale, qkv[1], qkv[2]
    attn = jax.nn.softmax(q @ jnp.swapaxes(k, -1, -2), axis=-1)
    out = (attn @ v).transpose(0, 2, 1, 3).reshape(B, N, C)
    out = out @ p['proj_w'].T + p['proj_b']
    x = x + out
    h2 = ln(x, p['ln2_g'], p['ln2_b'])
    h2 = jax.nn.gelu(h2 @ p['fc1_w'].T + p['fc1_b'], approximate=False)
    h2 = h2 @ p['fc2_w'].T + p['fc2_b']
    return x + h2


if __name__ == "__main__":
    B, N, C = 2, 8, 32
    num_heads = 4
    mlp_hidden = int(C * 4.0)

    key = jax.random.PRNGKey(0)
    keys = jax.random.split(key, 8)

    params = {
        'ln1_g': jnp.ones((1, C), jnp.float32),
        'ln1_b': jnp.zeros((1, C), jnp.float32),
        'qkv_w': 0.05 * jax.random.normal(keys[0], (3 * C, C), jnp.float32),
        'proj_w': 0.05 * jax.random.normal(keys[1], (C, C), jnp.float32),
        'proj_b': 0.05 * jax.random.normal(keys[2], (1, C), jnp.float32),
        'ln2_g': jnp.ones((1, C), jnp.float32),
        'ln2_b': jnp.zeros((1, C), jnp.float32),
        'fc1_w': 0.05 * jax.random.normal(keys[3], (mlp_hidden, C), jnp.float32),
        'fc1_b': 0.05 * jax.random.normal(keys[4], (1, mlp_hidden), jnp.float32),
        'fc2_w': 0.05 * jax.random.normal(keys[5], (C, mlp_hidden), jnp.float32),
        'fc2_b': 0.05 * jax.random.normal(keys[6], (1, C), jnp.float32),
    }

    x = jax.random.normal(keys[7], (B, N, C), jnp.float32)

    out = block_forward(x, params, num_heads)
    out = jax.block_until_ready(out)

    ref = block_reference(x, params, num_heads)
    # bf16 MXU inputs + approx reciprocal + tanh-GELU -> relaxed (but
    # tight-for-bf16) tolerance vs. the exact-GELU f32 reference.
    assert jnp.allclose(out, ref, atol=2e-2, rtol=2e-2), "mismatch vs reference"

    print("KERNEL_OK")
</pallas_src>

<mosaic_0001>
module attributes {stable_mosaic.version = 11 : i64} {
  func.func @attn_block_kernel(%arg0: i32, %arg1: i32, %arg2: memref<1x8x32xf32, #tpu.memory_space<vmem>>, %arg3: memref<1x32xf32, #tpu.memory_space<vmem>>, %arg4: memref<1x32xf32, #tpu.memory_space<vmem>>, %arg5: memref<1x32x32xbf16, #tpu.memory_space<vmem>>, %arg6: memref<1x32x32xbf16, #tpu.memory_space<vmem>>, %arg7: memref<1x32x32xbf16, #tpu.memory_space<vmem>>, %arg8: memref<1x32x32xbf16, #tpu.memory_space<vmem>>, %arg9: memref<1x32xf32, #tpu.memory_space<vmem>>, %arg10: memref<1x8x32xf32, #tpu.memory_space<vmem>>, %arg11: memref<8x32xbf16, #tpu.memory_space<vmem>>, %arg12: memref<8x32xf32, #tpu.memory_space<vmem>>) attributes {dimension_semantics = [#tpu.dimension_semantics<parallel>, #tpu.dimension_semantics<arbitrary>], iteration_bounds = array<i64: 2, 1>, scalar_prefetch = 0 : i64, scratch_operands = 2 : i64, tpu.core_type = #tpu.core_type<tc>, window_params = [{transform_indices = @transform_0, window_bounds = array<i64: 1, 8, 32>}, {pipeline_mode = #tpu.pipeline_mode<synchronous>, transform_indices = @transform_1, window_bounds = array<i64: 1, 32>}, {pipeline_mode = #tpu.pipeline_mode<synchronous>, transform_indices = @transform_2, window_bounds = array<i64: 1, 32>}, {pipeline_mode = #tpu.pipeline_mode<synchronous>, transform_indices = @transform_3, window_bounds = array<i64: 1, 32, 32>}, {pipeline_mode = #tpu.pipeline_mode<synchronous>, transform_indices = @transform_4, window_bounds = array<i64: 1, 32, 32>}, {pipeline_mode = #tpu.pipeline_mode<synchronous>, transform_indices = @transform_5, window_bounds = array<i64: 1, 32, 32>}, {pipeline_mode = #tpu.pipeline_mode<synchronous>, transform_indices = @transform_6, window_bounds = array<i64: 1, 32, 32>}, {pipeline_mode = #tpu.pipeline_mode<synchronous>, transform_indices = @transform_7, window_bounds = array<i64: 1, 32>}, {transform_indices = @transform_8, window_bounds = array<i64: 1, 8, 32>}]} {
    %c0_i32 = arith.constant 0 : i32
    %0 = arith.cmpi eq, %arg1, %c0_i32 : i32
    %1 = arith.extui %0 : i1 to i32
    %c0_i32_0 = arith.constant 0 : i32
    %2 = arith.cmpi ne, %1, %c0_i32_0 : i32
    scf.if %2 {
      %c0_35 = arith.constant 0 : index
      %c0_36 = arith.constant 0 : index
      %c0_37 = arith.constant 0 : index
      %95 = vector.load %arg2[%c0_35, %c0_36, %c0_37] : memref<1x8x32xf32, #tpu.memory_space<vmem>>, vector<1x8x32xf32>
      %96 = vector.shape_cast %95 : vector<1x8x32xf32> to vector<8x32xf32>
      %c0_38 = arith.constant 0 : index
      %c0_39 = arith.constant 0 : index
      %97 = vector.load %arg3[%c0_38, %c0_39] : memref<1x32xf32, #tpu.memory_space<vmem>>, vector<1x32xf32>
      %c0_40 = arith.constant 0 : index
      %c0_41 = arith.constant 0 : index
      %98 = vector.load %arg4[%c0_40, %c0_41] : memref<1x32xf32, #tpu.memory_space<vmem>>, vector<1x32xf32>
      %cst_42 = arith.constant dense<0.000000e+00> : vector<8xf32>
      %99 = vector.multi_reduction <add>, %96, %cst_42 [1] : vector<8x32xf32> to vector<8xf32>
      %100 = vector.shape_cast %99 : vector<8xf32> to vector<8x1xf32>
      %cst_43 = arith.constant 3.200000e+01 : f32
      %101 = vector.broadcast %cst_43 : f32 to vector<8x1xf32>
      %102 = arith.divf %100, %101 : vector<8x1xf32>
      %103 = vector.broadcast %102 : vector<8x1xf32> to vector<8x32xf32>
      %104 = arith.subf %96, %103 : vector<8x32xf32>
      %105 = arith.mulf %104, %104 : vector<8x32xf32>
      %cst_44 = arith.constant dense<0.000000e+00> : vector<8xf32>
      %106 = vector.multi_reduction <add>, %105, %cst_44 [1] : vector<8x32xf32> to vector<8xf32>
      %107 = vector.shape_cast %106 : vector<8xf32> to vector<8x1xf32>
      %cst_45 = arith.constant 3.200000e+01 : f32
      %108 = vector.broadcast %cst_45 : f32 to vector<8x1xf32>
      %109 = arith.divf %107, %108 : vector<8x1xf32>
      %cst_46 = arith.constant 9.99999974E-6 : f32
      %110 = vector.broadcast %cst_46 : f32 to vector<8x1xf32>
      %111 = arith.addf %109, %110 : vector<8x1xf32>
      %112 = math.rsqrt %111 : vector<8x1xf32>
      %113 = vector.broadcast %102 : vector<8x1xf32> to vector<8x32xf32>
      %114 = arith.subf %96, %113 : vector<8x32xf32>
      %115 = vector.broadcast %112 : vector<8x1xf32> to vector<8x32xf32>
      %116 = arith.mulf %114, %115 : vector<8x32xf32>
      %117 = vector.broadcast %97 : vector<1x32xf32> to vector<8x32xf32>
      %118 = arith.mulf %116, %117 : vector<8x32xf32>
      %119 = vector.broadcast %98 : vector<1x32xf32> to vector<8x32xf32>
      %120 = arith.addf %118, %119 : vector<8x32xf32>
      %121 = arith.truncf %120 : vector<8x32xf32> to vector<8x32xbf16>
      %c0_47 = arith.constant 0 : index
      %c0_48 = arith.constant 0 : index
      %122 = vector.load %arg11[%c0_47, %c0_48] : memref<8x32xbf16, #tpu.memory_space<vmem>>, vector<8x32xbf16>
      tpu.vector_store %arg11[%c0_47, %c0_48], %121 {strides = array<i32>} : memref<8x32xbf16, #tpu.memory_space<vmem>>, vector<8x32xbf16>,
      %c0_49 = arith.constant 0 : index
      %c0_50 = arith.constant 0 : index
      %123 = vector.load %arg9[%c0_49, %c0_50] : memref<1x32xf32, #tpu.memory_space<vmem>>, vector<1x32xf32>
      %124 = vector.broadcast %123 : vector<1x32xf32> to vector<8x32xf32>
      %125 = arith.addf %96, %124 : vector<8x32xf32>
      %c0_51 = arith.constant 0 : index
      %c0_52 = arith.constant 0 : index
      %126 = vector.load %arg12[%c0_51, %c0_52] : memref<8x32xf32, #tpu.memory_space<vmem>>, vector<8x32xf32>
      tpu.vector_store %arg12[%c0_51, %c0_52], %125 {strides = array<i32>} : memref<8x32xf32, #tpu.memory_space<vmem>>, vector<8x32xf32>,
    } else {
    }
    %c0 = arith.constant 0 : index
    %c0_1 = arith.constant 0 : index
    %3 = vector.load %arg11[%c0, %c0_1] : memref<8x32xbf16, #tpu.memory_space<vmem>>, vector<8x32xbf16>
    %4 = arith.index_cast %arg1 : i32 to index
    %c0_2 = arith.constant 0 : index
    %c0_3 = arith.constant 0 : index
    %5 = vector.load %arg5[%4, %c0_2, %c0_3] : memref<1x32x32xbf16, #tpu.memory_space<vmem>>, vector<1x32x32xbf16>
    %6 = vector.shape_cast %5 : vector<1x32x32xbf16> to vector<32x32xbf16>
    %cst = arith.constant dense<0.000000e+00> : vector<8x32xf32>
    %7 = tpu.matmul %3, %6, %cst {dimension_numbers = #tpu.dot_dimension_numbers<[1], [0], [0], [1], [0, 0, 1, 1], [], []>} : vector<8x32xbf16>, vector<32x32xbf16>, vector<8x32xf32> -> vector<8x32xf32>
    %8 = arith.truncf %7 : vector<8x32xf32> to vector<8x32xbf16>
    %9 = arith.index_cast %arg1 : i32 to index
    %c0_4 = arith.constant 0 : index
    %c0_5 = arith.constant 0 : index
    %10 = vector.load %arg6[%9, %c0_4, %c0_5] : memref<1x32x32xbf16, #tpu.memory_space<vmem>>, vector<1x32x32xbf16>
    %11 = vector.shape_cast %10 : vector<1x32x32xbf16> to vector<32x32xbf16>
    %cst_6 = arith.constant dense<0.000000e+00> : vector<8x32xf32>
    %12 = tpu.matmul %3, %11, %cst_6 {dimension_numbers = #tpu.dot_dimension_numbers<[1], [0], [0], [1], [0, 0, 1, 1], [], []>} : vector<8x32xbf16>, vector<32x32xbf16>, vector<8x32xf32> -> vector<8x32xf32>
    %13 = arith.truncf %12 : vector<8x32xf32> to vector<8x32xbf16>
    %14 = arith.index_cast %arg1 : i32 to index
    %c0_7 = arith.constant 0 : index
    %c0_8 = arith.constant 0 : index
    %15 = vector.load %arg7[%14, %c0_7, %c0_8] : memref<1x32x32xbf16, #tpu.memory_space<vmem>>, vector<1x32x32xbf16>
    %16 = vector.shape_cast %15 : vector<1x32x32xbf16> to vector<32x32xbf16>
    %cst_9 = arith.constant dense<0.000000e+00> : vector<8x32xf32>
    %17 = tpu.matmul %3, %16, %cst_9 {dimension_numbers = #tpu.dot_dimension_numbers<[1], [0], [0], [1], [0, 0, 1, 1], [], []>} : vector<8x32xbf16>, vector<32x32xbf16>, vector<8x32xf32> -> vector<8x32xf32>
    %18 = arith.truncf %17 : vector<8x32xf32> to vector<8x32xbf16>
    %19 = vector.extract_strided_slice %8 {offsets = [0, 0], sizes = [8, 8], strides = [1, 1]} : vector<8x32xbf16> to vector<8x8xbf16>
    %20 = vector.extract_strided_slice %13 {offsets = [0, 0], sizes = [8, 8], strides = [1, 1]} : vector<8x32xbf16> to vector<8x8xbf16>
    %21 = vector.extract_strided_slice %18 {offsets = [0, 0], sizes = [8, 8], strides = [1, 1]} : vector<8x32xbf16> to vector<8x8xbf16>
    %cst_10 = arith.constant dense<0.000000e+00> : vector<8x8xf32>
    %22 = tpu.matmul %19, %20, %cst_10 {dimension_numbers = #tpu.dot_dimension_numbers<[1], [1], [0], [0], [0, 0, 1, 0], [], []>} : vector<8x8xbf16>, vector<8x8xbf16>, vector<8x8xf32> -> vector<8x8xf32>
    %cst_11 = arith.constant dense<0xFF800000> : vector<8xf32>
    %23 = vector.multi_reduction <maximumf>, %22, %cst_11 [1] : vector<8x8xf32> to vector<8xf32>
    %24 = vector.shape_cast %23 : vector<8xf32> to vector<8x1xf32>
    %25 = vector.broadcast %24 : vector<8x1xf32> to vector<8x8xf32>
    %26 = arith.subf %22, %25 : vector<8x8xf32>
    %27 = math.exp %26 : vector<8x8xf32>
    %cst_12 = arith.constant dense<0.000000e+00> : vector<8xf32>
    %28 = vector.multi_reduction <add>, %27, %cst_12 [1] : vector<8x8xf32> to vector<8xf32>
    %29 = vector.shape_cast %28 : vector<8xf32> to vector<8x1xf32>
    %30 = tpu.reciprocal %29 {approx = true} : vector<8x1xf32> -> vector<8x1xf32>
    %31 = vector.broadcast %30 : vector<8x1xf32> to vector<8x8xf32>
    %32 = arith.mulf %27, %31 : vector<8x8xf32>
    %33 = arith.truncf %32 : vector<8x8xf32> to vector<8x8xbf16>
    %cst_13 = arith.constant dense<0.000000e+00> : vector<8x8xf32>
    %34 = tpu.matmul %33, %21, %cst_13 {dimension_numbers = #tpu.dot_dimension_numbers<[1], [0], [0], [1], [0, 0, 1, 1], [], []>} : vector<8x8xbf16>, vector<8x8xbf16>, vector<8x8xf32> -> vector<8x8xf32>
    %35 = vector.extract_strided_slice %8 {offsets = [0, 8], sizes = [8, 8], strides = [1, 1]} : vector<8x32xbf16> to vector<8x8xbf16>
    %36 = vector.extract_strided_slice %13 {offsets = [0, 8], sizes = [8, 8], strides = [1, 1]} : vector<8x32xbf16> to vector<8x8xbf16>
    %37 = vector.extract_strided_slice %18 {offsets = [0, 8], sizes = [8, 8], strides = [1, 1]} : vector<8x32xbf16> to vector<8x8xbf16>
    %cst_14 = arith.constant dense<0.000000e+00> : vector<8x8xf32>
    %38 = tpu.matmul %35, %36, %cst_14 {dimension_numbers = #tpu.dot_dimension_numbers<[1], [1], [0], [0], [0, 0, 1, 0], [], []>} : vector<8x8xbf16>, vector<8x8xbf16>, vector<8x8xf32> -> vector<8x8xf32>
    %cst_15 = arith.constant dense<0xFF800000> : vector<8xf32>
    %39 = vector.multi_reduction <maximumf>, %38, %cst_15 [1] : vector<8x8xf32> to vector<8xf32>
    %40 = vector.shape_cast %39 : vector<8xf32> to vector<8x1xf32>
    %41 = vector.broadcast %40 : vector<8x1xf32> to vector<8x8xf32>
    %42 = arith.subf %38, %41 : vector<8x8xf32>
    %43 = math.exp %42 : vector<8x8xf32>
    %cst_16 = arith.constant dense<0.000000e+00> : vector<8xf32>
    %44 = vector.multi_reduction <add>, %43, %cst_16 [1] : vector<8x8xf32> to vector<8xf32>
    %45 = vector.shape_cast %44 : vector<8xf32> to vector<8x1xf32>
    %46 = tpu.reciprocal %45 {approx = true} : vector<8x1xf32> -> vector<8x1xf32>
    %47 = vector.broadcast %46 : vector<8x1xf32> to vector<8x8xf32>
    %48 = arith.mulf %43, %47 : vector<8x8xf32>
    %49 = arith.truncf %48 : vector<8x8xf32> to vector<8x8xbf16>
    %cst_17 = arith.constant dense<0.000000e+00> : vector<8x8xf32>
    %50 = tpu.matmul %49, %37, %cst_17 {dimension_numbers = #tpu.dot_dimension_numbers<[1], [0], [0], [1], [0, 0, 1, 1], [], []>} : vector<8x8xbf16>, vector<8x8xbf16>, vector<8x8xf32> -> vector<8x8xf32>
    %51 = vector.extract_strided_slice %8 {offsets = [0, 16], sizes = [8, 8], strides = [1, 1]} : vector<8x32xbf16> to vector<8x8xbf16>
    %52 = vector.extract_strided_slice %13 {offsets = [0, 16], sizes = [8, 8], strides = [1, 1]} : vector<8x32xbf16> to vector<8x8xbf16>
    %53 = vector.extract_strided_slice %18 {offsets = [0, 16], sizes = [8, 8], strides = [1, 1]} : vector<8x32xbf16> to vector<8x8xbf16>
    %cst_18 = arith.constant dense<0.000000e+00> : vector<8x8xf32>
    %54 = tpu.matmul %51, %52, %cst_18 {dimension_numbers = #tpu.dot_dimension_numbers<[1], [1], [0], [0], [0, 0, 1, 0], [], []>} : vector<8x8xbf16>, vector<8x8xbf16>, vector<8x8xf32> -> vector<8x8xf32>
    %cst_19 = arith.constant dense<0xFF800000> : vector<8xf32>
    %55 = vector.multi_reduction <maximumf>, %54, %cst_19 [1] : vector<8x8xf32> to vector<8xf32>
    %56 = vector.shape_cast %55 : vector<8xf32> to vector<8x1xf32>
    %57 = vector.broadcast %56 : vector<8x1xf32> to vector<8x8xf32>
    %58 = arith.subf %54, %57 : vector<8x8xf32>
    %59 = math.exp %58 : vector<8x8xf32>
    %cst_20 = arith.constant dense<0.000000e+00> : vector<8xf32>
    %60 = vector.multi_reduction <add>, %59, %cst_20 [1] : vector<8x8xf32> to vector<8xf32>
    %61 = vector.shape_cast %60 : vector<8xf32> to vector<8x1xf32>
    %62 = tpu.reciprocal %61 {approx = true} : vector<8x1xf32> -> vector<8x1xf32>
    %63 = vector.broadcast %62 : vector<8x1xf32> to vector<8x8xf32>
    %64 = arith.mulf %59, %63 : vector<8x8xf32>
    %65 = arith.truncf %64 : vector<8x8xf32> to vector<8x8xbf16>
    %cst_21 = arith.constant dense<0.000000e+00> : vector<8x8xf32>
    %66 = tpu.matmul %65, %53, %cst_21 {dimension_numbers = #tpu.dot_dimension_numbers<[1], [0], [0], [1], [0, 0, 1, 1], [], []>} : vector<8x8xbf16>, vector<8x8xbf16>, vector<8x8xf32> -> vector<8x8xf32>
    %67 = vector.extract_strided_slice %8 {offsets = [0, 24], sizes = [8, 8], strides = [1, 1]} : vector<8x32xbf16> to vector<8x8xbf16>
    %68 = vector.extract_strided_slice %13 {offsets = [0, 24], sizes = [8, 8], strides = [1, 1]} : vector<8x32xbf16> to vector<8x8xbf16>
    %69 = vector.extract_strided_slice %18 {offsets = [0, 24], sizes = [8, 8], strides = [1, 1]} : vector<8x32xbf16> to vector<8x8xbf16>
    %cst_22 = arith.constant dense<0.000000e+00> : vector<8x8xf32>
    %70 = tpu.matmul %67, %68, %cst_22 {dimension_numbers = #tpu.dot_dimension_numbers<[1], [1], [0], [0], [0, 0, 1, 0], [], []>} : vector<8x8xbf16>, vector<8x8xbf16>, vector<8x8xf32> -> vector<8x8xf32>
    %cst_23 = arith.constant dense<0xFF800000> : vector<8xf32>
    %71 = vector.multi_reduction <maximumf>, %70, %cst_23 [1] : vector<8x8xf32> to vector<8xf32>
    %72 = vector.shape_cast %71 : vector<8xf32> to vector<8x1xf32>
    %73 = vector.broadcast %72 : vector<8x1xf32> to vector<8x8xf32>
    %74 = arith.subf %70, %73 : vector<8x8xf32>
    %75 = math.exp %74 : vector<8x8xf32>
    %cst_24 = arith.constant dense<0.000000e+00> : vector<8xf32>
    %76 = vector.multi_reduction <add>, %75, %cst_24 [1] : vector<8x8xf32> to vector<8xf32>
    %77 = vector.shape_cast %76 : vector<8xf32> to vector<8x1xf32>
    %78 = tpu.reciprocal %77 {approx = true} : vector<8x1xf32> -> vector<8x1xf32>
    %79 = vector.broadcast %78 : vector<8x1xf32> to vector<8x8xf32>
    %80 = arith.mulf %75, %79 : vector<8x8xf32>
    %81 = arith.truncf %80 : vector<8x8xf32> to vector<8x8xbf16>
    %cst_25 = arith.constant dense<0.000000e+00> : vector<8x8xf32>
    %82 = tpu.matmul %81, %69, %cst_25 {dimension_numbers = #tpu.dot_dimension_numbers<[1], [0], [0], [1], [0, 0, 1, 1], [], []>} : vector<8x8xbf16>, vector<8x8xbf16>, vector<8x8xf32> -> vector<8x8xf32>
    %83 = tpu.concatenate %34, %50, %66, %82 in 1 : vector<8x8xf32>, vector<8x8xf32>, vector<8x8xf32>, vector<8x8xf32> -> vector<8x32xf32>
    %84 = arith.truncf %83 : vector<8x32xf32> to vector<8x32xbf16>
    %c0_26 = arith.constant 0 : index
    %c0_27 = arith.constant 0 : index
    %85 = vector.load %arg12[%c0_26, %c0_27] : memref<8x32xf32, #tpu.memory_space<vmem>>, vector<8x32xf32>
    %86 = arith.index_cast %arg1 : i32 to index
    %c0_28 = arith.constant 0 : index
    %c0_29 = arith.constant 0 : index
    %87 = vector.load %arg8[%86, %c0_28, %c0_29] : memref<1x32x32xbf16, #tpu.memory_space<vmem>>, vector<1x32x32xbf16>
    %88 = vector.shape_cast %87 : vector<1x32x32xbf16> to vector<32x32xbf16>
    %cst_30 = arith.constant dense<0.000000e+00> : vector<8x32xf32>
    %89 = tpu.matmul %84, %88, %cst_30 {dimension_numbers = #tpu.dot_dimension_numbers<[1], [0], [0], [1], [0, 0, 1, 1], [], []>} : vector<8x32xbf16>, vector<32x32xbf16>, vector<8x32xf32> -> vector<8x32xf32>
    %90 = arith.addf %85, %89 : vector<8x32xf32>
    %c0_31 = arith.constant 0 : index
    %c0_32 = arith.constant 0 : index
    %91 = vector.load %arg12[%c0_31, %c0_32] : memref<8x32xf32, #tpu.memory_space<vmem>>, vector<8x32xf32>
    tpu.vector_store %arg12[%c0_31, %c0_32], %90 {strides = array<i32>} : memref<8x32xf32, #tpu.memory_space<vmem>>, vector<8x32xf32>,
    %c0_i32_33 = arith.constant 0 : i32
    %92 = arith.cmpi eq, %arg1, %c0_i32_33 : i32
    %93 = arith.extui %92 : i1 to i32
    %c0_i32_34 = arith.constant 0 : i32
    %94 = arith.cmpi ne, %93, %c0_i32_34 : i32
    scf.if %94 {
      %c0_35 = arith.constant 0 : index
      %c0_36 = arith.constant 0 : index
      %95 = vector.load %arg12[%c0_35, %c0_36] : memref<8x32xf32, #tpu.memory_space<vmem>>, vector<8x32xf32>
      %c0_37 = arith.constant 0 : index
      %c0_38 = arith.constant 0 : index
      %c0_39 = arith.constant 0 : index
      %96 = vector.load %arg10[%c0_37, %c0_38, %c0_39] : memref<1x8x32xf32, #tpu.memory_space<vmem>>, vector<1x8x32xf32>
      %97 = vector.shape_cast %96 : vector<1x8x32xf32> to vector<8x32xf32>
      %98 = vector.shape_cast %95 : vector<8x32xf32> to vector<1x8x32xf32>
      tpu.vector_store %arg10[%c0_37, %c0_38, %c0_39], %98 {strides = array<i32>} : memref<1x8x32xf32, #tpu.memory_space<vmem>>, vector<1x8x32xf32>,
    } else {
    }
    return
  }
  func.func @transform_0(%arg0: i32, %arg1: i32) -> (i32, i32, i32) {
    %c0_i32 = arith.constant 0 : i32
    %c0_i32_0 = arith.constant 0 : i32
    %c0_i32_1 = arith.constant 0 : i32
    return %arg0, %c0_i32, %c0_i32_0 : i32, i32, i32
  }
  func.func @transform_1(%arg0: i32, %arg1: i32) -> (i32, i32) {
    %c0_i32 = arith.constant 0 : i32
    %c0_i32_0 = arith.constant 0 : i32
    %c0_i32_1 = arith.constant 0 : i32
    return %c0_i32, %c0_i32_0 : i32, i32
  }
  func.func @transform_2(%arg0: i32, %arg1: i32) -> (i32, i32) {
    %c0_i32 = arith.constant 0 : i32
    %c0_i32_0 = arith.constant 0 : i32
    %c0_i32_1 = arith.constant 0 : i32
    return %c0_i32, %c0_i32_0 : i32, i32
  }
  func.func @transform_3(%arg0: i32, %arg1: i32) -> (i32, i32, i32) {
    %c0_i32 = arith.constant 0 : i32
    %c0_i32_0 = arith.constant 0 : i32
    %c0_i32_1 = arith.constant 0 : i32
    %c0_i32_2 = arith.constant 0 : i32
    return %c0_i32, %c0_i32_0, %c0_i32_1 : i32, i32, i32
  }
  func.func @transform_4(%arg0: i32, %arg1: i32) -> (i32, i32, i32) {
    %c0_i32 = arith.constant 0 : i32
    %c0_i32_0 = arith.constant 0 : i32
    %c0_i32_1 = arith.constant 0 : i32
    %c0_i32_2 = arith.constant 0 : i32
    return %c0_i32, %c0_i32_0, %c0_i32_1 : i32, i32, i32
  }
  func.func @transform_5(%arg0: i32, %arg1: i32) -> (i32, i32, i32) {
    %c0_i32 = arith.constant 0 : i32
    %c0_i32_0 = arith.constant 0 : i32
    %c0_i32_1 = arith.constant 0 : i32
    %c0_i32_2 = arith.constant 0 : i32
    return %c0_i32, %c0_i32_0, %c0_i32_1 : i32, i32, i32
  }
  func.func @transform_6(%arg0: i32, %arg1: i32) -> (i32, i32, i32) {
    %c0_i32 = arith.constant 0 : i32
    %c0_i32_0 = arith.constant 0 : i32
    %c0_i32_1 = arith.constant 0 : i32
    %c0_i32_2 = arith.constant 0 : i32
    return %c0_i32, %c0_i32_0, %c0_i32_1 : i32, i32, i32
  }
  func.func @transform_7(%arg0: i32, %arg1: i32) -> (i32, i32) {
    %c0_i32 = arith.constant 0 : i32
    %c0_i32_0 = arith.constant 0 : i32
    %c0_i32_1 = arith.constant 0 : i32
    return %c0_i32, %c0_i32_0 : i32, i32
  }
  func.func @transform_8(%arg0: i32, %arg1: i32) -> (i32, i32, i32) {
    %c0_i32 = arith.constant 0 : i32
    %c0_i32_0 = arith.constant 0 : i32
    %c0_i32_1 = arith.constant 0 : i32
    return %arg0, %c0_i32, %c0_i32_0 : i32, i32, i32
  }
}

</mosaic_0001>

<bundles_post_ra>
// kernel: tpu_custom_call.1
= control target key start
LH: loop header
LB: loop body
LE: loop exit
PB: predicated region body
PF: predicated region fallthrough
CT: control target
= control target key end

     0   :  { %s2177_s0 = inlined_call_operand.hbm [shape: f32[2,8,32], index: 0, kind: input, shape index: {}]   ;;  %s2178_s1 = inlined_call_operand.vmem [shape: f32[1,32], index: 1, kind: input, shape index: {}]   ;;  %s2179_s2 = inlined_call_operand.vmem [shape: f32[1,32], index: 2, kind: input, shape index: {}]   ;;  %s2180_s3 = inlined_call_operand.hbm [shape: bf16[1,32,32], index: 3, kind: input, shape index: {}]   ;;  %s2181_s4 = inlined_call_operand.hbm [shape: bf16[1,32,32], index: 4, kind: input, shape index: {}]   ;;  %s2182_s5 = inlined_call_operand.hbm [shape: bf16[1,32,32], index: 5, kind: input, shape index: {}]   ;;  %s2183_s6 = inlined_call_operand.hbm [shape: bf16[1,32,32], index: 6, kind: input, shape index: {}]   ;;  %s2184_s7 = inlined_call_operand.vmem [shape: f32[1,32], index: 7, kind: input, shape index: {}]   ;;  %s2185_s8 = inlined_call_operand.hbm [shape: f32[2,8,32], index: 8, kind: output, shape index: {}]  }
   0x1   :  { %2187 = sst [smem:[#allocation19_spill]] %s2180_s3 }
   0x2   :  { %2188 = sst [smem:[#allocation20_spill]] %s2181_s4 }
   0x3   :  { %2189 = sst [smem:[#allocation21_spill]] %s2182_s5 }
   0x4   :  { %2190 = sst [smem:[#allocation22_spill]] %s2183_s6 }
   0x5   :  { %13 = vsyncpa [#allocation5], 0 }
   0x6   :  { %15 = vsyncpa [#allocation5 + $0x1], 0 }
   0x7   :  { %16 = vsyncpa [#allocation8], 0 }
   0x8   :  { %17 = vsyncpa [#allocation11], 0 }
   0x9   :  { %18 = vsyncpa [#allocation6], 0 }
   0xa   :  { %20 = vsyncpa [#allocation6 + $0x1], 0  ;;  %s1861_s27 = smov 0   ;;  %s1863_s28 = smov 0  }
   0xb   :  { %s1865_s29 = smov 0   ;;  %s1867_s30 = smov 0  }
   0xc   :  { %s1869_s9 = smov 0   ;;  %s1871_s10 = smov 0  }
   0xd LB: > { %s1287_s11 = sadd.s32 4294967295, %s1798_s10   ;;  %p1289_p0 = scmp.ge.s32.totalorder %s1798_s10, 1  ;;  %s1798_s10 = sphi %s1871_s10, %s26_s10   ;;  %s1794_s9 = sphi %s1869_s9, %s2211_s9   ;;  %s1790_s30 = sphi %s1867_s30, %s2210_s30   ;;  %s1786_s29 = sphi %s1865_s29, %s2209_s29   ;;  %s1782_s28 = sphi %s1863_s28, %s2208_s28   ;;  %s1778_s27 = sphi %s1861_s27, %s2207_s27  }
   0xe   : > { %p1895_p1 = scmp.eq.s32.totalorder %s1287_s11, 0  ;;  %p242_p2 = scmp.lt.s32.totalorder %s1798_s10, 3 }
   0xf   : > { %s1800_s14 = smov [#allocation7]   ;;  %s1801_s17 = smov [#allocation10]  }
  0x10   : > { %p1900_p3 = pnand %p1289_p0, %p242_p2  ;;  %s260_s15 = sshll.u32 %s1800_s14, 4  ;;  %s261_s15 = int_to_ptr.vmem [resolvable:$true] %s260_s15 }
  0x11   : > { %s286_s18 = sshll.u32 %s1801_s17, 4  ;;  %s1802_s19 = smov [#allocation9]   ;;  %s287_s18 = int_to_ptr.vmem [resolvable:$true] %s286_s18 }
  0x12   : > { %p1459_p4 = pneg %p1900_p3  ;;  %s273_s20 = sshll.u32 %s1802_s19, 4  ;;  %s274_s20 = int_to_ptr.vmem [resolvable:$true] %s273_s20 }
  0x13   : > { %s1589_s21 = scalar_lea.vmem %s261_s15, 256  ;;  %p1597_p11 = scmp.lt.s32.totalorder %s261_s15, %s261_s15 }
  0x14   : > { %p1909_p6 = pnand %p1459_p4, %p1895_p1  ;;  %p1590_p8 = scmp.ne.s32.totalorder %s261_s15, %s1589_s21 }
  0x15   : > { %p1598_p12 = scmp.lt.s32.totalorder %s1589_s21, %s1589_s21 }
  0x16   : > { %p1580_p7 = pneg %p1909_p6 }
  0x17   : > { %p1599_p13 = por %p1598_p12, %p1597_p11 }
  0x18   : > { %p1592_p9 = pnand %p1590_p8, %p1580_p7 }
  0x1a   : > { %p1593_p10 = pneg %p1592_p9 }
  0x1c   : > { %p1600_p0 = pnand %p1599_p13, %p1593_p10 }
  0x1e   : > { %1603 = shalt.err (!%p1600_p0)
}
  0x1f   : > { %s1803_s22 = smov 64   ;;  %s1804_s23 = smov 4  }
  0x20   : > { %s2194_s3 = sld [smem:[#allocation19_spill]]  ;;  %s1615_s26 = scalar_lea.vmem %s287_s18, 256 }
  0x21   : > { %p1616_p2 = scmp.ne.s32.totalorder %s287_s18, %s1615_s26  ;;  %p1623_p9 = scmp.lt.s32.totalorder %s287_s18, %s287_s18 }
  0x22   : > { %p1624_p10 = scmp.lt.s32.totalorder %s1615_s26, %s1615_s26 }
  0x23   : > { %p1618_p4 = pnand %p1616_p2, %p1580_p7 }
  0x24   : > { %p1625_p11 = por %p1624_p10, %p1623_p9 }
  0x25   : > { %p1619_p8 = pneg %p1618_p4 }
  0x26   : > { %1462 = dma.hbm_to_vmem [thread:$0]  (!%p1909_p6), %s2194_s3, 256, %s261_s15, [#allocation8], %s1803_s22, %s1803_s22, %s1804_s23  }
  0x27   : > { %p1626_p12 = pnand %p1625_p11, %p1619_p8 }
  0x29   : > { %1629 = shalt.err (!%p1626_p12)
}
  0x2a   : > { %s2195_s5 = sld [smem:[#allocation21_spill]]  ;;  %s1641_s15 = scalar_lea.vmem %s274_s20, 256 }
  0x2b   : > { %p1642_p13 = scmp.ne.s32.totalorder %s274_s20, %s1641_s15  ;;  %p1649_p4 = scmp.lt.s32.totalorder %s274_s20, %s274_s20 }
  0x2c   : > { %p1650_p8 = scmp.lt.s32.totalorder %s1641_s15, %s1641_s15 }
  0x2d   : > { %p1644_p0 = pnand %p1642_p13, %p1580_p7 }
  0x2e   : > { %p1651_p9 = por %p1650_p8, %p1649_p4 }
  0x2f   : > { %p1645_p2 = pneg %p1644_p0 }
  0x30   : > { %1468 = dma.hbm_to_vmem [thread:$0]  (!%p1909_p6), %s2195_s5, 256, %s287_s18, [#allocation11], %s1803_s22, %s1803_s22, %s1804_s23  }
  0x31   : > { %p1652_p10 = pnand %p1651_p9, %p1645_p2 }
  0x33   : > { %1655 = shalt.err (!%p1652_p10)
}
  0x34   : > { %s2196_s4 = sld [smem:[#allocation20_spill]]  ;;  %s1805_s18 = smov [#allocation12]  }
  0x35   : > { %s299_s24 = sshll.u32 %s1805_s18, 4  ;;  %s300_s24 = int_to_ptr.vmem [resolvable:$true] %s299_s24 }
  0x36   : > { %s1667_s25 = scalar_lea.vmem %s300_s24, 256  ;;  %p1675_p0 = scmp.lt.s32.totalorder %s300_s24, %s300_s24 }
  0x37   : > { %p1668_p11 = scmp.ne.s32.totalorder %s300_s24, %s1667_s25  ;;  %p1676_p2 = scmp.lt.s32.totalorder %s1667_s25, %s1667_s25 }
  0x39   : > { %p1670_p12 = pnand %p1668_p11, %p1580_p7  ;;  %p1677_p4 = por %p1676_p2, %p1675_p0 }
  0x3a   : > { %1465 = dma.hbm_to_vmem [thread:$0]  (!%p1909_p6), %s2196_s4, 256, %s274_s20, [#allocation8], %s1803_s22, %s1803_s22, %s1804_s23  }
  0x3b   : > { %p1671_p13 = pneg %p1670_p12 }
  0x3d   : > { %p1678_p8 = pnand %p1677_p4, %p1671_p13 }
  0x3f   : > { %1681 = shalt.err (!%p1678_p8)
}
  0x40   : > { %s2197_s6 = sld [smem:[#allocation22_spill]]  ;;  %s1288_s16 = sadd.s32 4294967294, %s1798_s10  }
  0x41   : > { %s38_s14 = sadd.s32 1, %s1794_s9  ;;  %s45_s17 = sadd.s32 1, %s1786_s29 }
  0x42   : > { %p40_p7 = scmp.ge.s32.totalorder %s38_s14, 2  ;;  %p52_p9 = scmp.ne.s32.totalorder %s1786_s29, %s1782_s28 }
  0x43   : > { %p53_p10 = scmp.eq.s32.totalorder %s1798_s10, 0  ;;  %p58_p12 = scmp.ne.s32.totalorder %s1782_s28, %s1778_s27 }
  0x44   : > { %s2213_s14 = smov (%p40_p7, %s38_s14), 0  ;;  %p235_p4 = scmp.eq.s32.totalorder %s1288_s16, 1 }
  0x45   : > { %2198 = sst [smem:[#allocation18_spill]] %s2213_s14  ;;  %p1967_p11 = por %p53_p10, %p52_p9 }
  0x46   : > { %1471 = dma.hbm_to_vmem [thread:$0]  (!%p1909_p6), %s2197_s6, 256, %s300_s24, [#allocation11], %s1803_s22, %s1803_s22, %s1804_s23  }
  0x47   : > { %s42_s22 = ssub.s32 %s1794_s9, %s2213_s14  ;;  %p229_p6 = scmp.eq.s32.totalorder %s1287_s11, 1 }
  0x48   : > { %p43_p13 = scmp.eq.s32.totalorder %s42_s22, 0  ;;  %p1979_p0 = por %p1895_p1, %p58_p12 }
  0x49   : > { %p1983_p2 = por %p229_p6, %p52_p9  ;;  %p1990_p8 = por %p235_p4, %p58_p12 }
  0x4a   : > { %s1988_s21 = scalar_select %p43_p13, %s1786_s29, %s45_s17  }
  0x4b   : > { %s2202_s18 = scalar_select %p1990_p8, 1, 0 }
  0x4c   : > { %p1484_p7 = scmp.lt.s32.totalorder %s1798_s10, 2  ;;  %s316_s24 = sand.u32 1, %s1786_s29  }
  0x4d   : > { %s1296_s11 = sshll.u32 %s1794_s9, 7  ;;  %s1295_s25 = sshll.u32 %s316_s24, 3 }
  0x4e   : > { %s325_s22 = scalar_lea.hbm %s2177_s0, %s1296_s11  ;;  %s320_s3 = scalar_lea.vmem [#allocation4], %s1295_s25 }
  0x4f   : > { %s327_s4 = sshll.u32 %s320_s3, 4  ;;  %p2002_p9 = pnand %p1484_p7, %p1967_p11  ;;  %s328_s4 = int_to_ptr.vmem [resolvable:$true] %s327_s4 }
  0x50   : > { %s317_s16 = scalar_lea.sflag [#allocation5], %s316_s24  ;;  %s1695_s17 = scalar_lea.vmem %s328_s4, 128 }
  0x51   : > { %p1684_p10 = pneg %p2002_p9  ;;  %p1696_p12 = scmp.ne.s32.totalorder %s328_s4, %s1695_s17 }
  0x52   : > { %s1806_s6 = smov [#allocation4]  }
  0x53   : > { %p1698_p6 = pnand %p1696_p12, %p1684_p10  ;;  %s1700_s14 = sshll.u32 %s1806_s6, 4  ;;  %s1701_s14 = int_to_ptr.vmem [resolvable:$false] %s1700_s14 }
  0x54   : > { %s1702_s11 = scalar_lea.vmem %s1701_s14, 256  ;;  %p1703_p4 = scmp.lt.s32.totalorder %s328_s4, %s1701_s14 }
  0x55   : > { %p1699_p13 = pneg %p1698_p6  ;;  %p1704_p5 = scmp.lt.s32.totalorder %s1702_s11, %s1695_s17 }
  0x57   : > { %p1705_p8 = por %p1704_p5, %p1703_p4 }
  0x59   : > { %p1706_p11 = pnand %p1705_p8, %p1699_p13 }
  0x5b   : > { %1709 = shalt.err (!%p1706_p11)
}
  0x5c   : > { %1475 = dma.hbm_to_vmem [thread:$0]  (!%p2002_p9), %s325_s22, 128, %s328_s4, %s317_s16  }
  0x5d   : > { %336 = sbr.rel (%p1900_p3) target bundleno = 1827 (0x723), region = 52  ;;  %s2013_s3 = sand.u32 (!%p1900_p3), 1, %s1782_s28  }
  0x5e   : > { %s1298_s6 = sshll.u32 (!%p1900_p3), %s2013_s3, 3  ;;  %s339_s15 = scalar_lea.sflag (!%p1900_p3), [#allocation5], %s2013_s3 }
  0x5f   : > { %s342_s14 = scalar_lea.vmem (!%p1900_p3), [#allocation4], %s1298_s6 }
  0x62   : > { %1761 = dma.done.wait (%p1979_p0), %s339_s15, 128  }
  0x63   : > { %1763 = vsyncadd (%p1979_p0), %s339_s15, 4294967168 }
  0x64   : > { %1765 = dma.done.wait (%p1895_p1), [#allocation8], 512  }
  0x65   : > { %1767 = vsyncadd (%p1895_p1), [#allocation8], 4294966784 }
  0x66   : > { %1769 = dma.done.wait (%p1895_p1), [#allocation11], 512  }
  0x67   : > { %1771 = vsyncadd (%p1895_p1), [#allocation11], 4294966784  ;;  %vm399_vm0 = vcmask 261120   ;;  %v396_v0 = vld [vmem:[%s342_s14] sm:$0xff]  ;;  %v1306_v1 = vld [vmem:[%s2184_s7] ss:$0 sm:$0xff] }
  0x68   : > { %v400_v2 = vsel %vm399_vm0, %v396_v0, 0.0  ;;  %v438_v3 = vadd.f32 %v1306_v1, %v396_v0  ;;  %v1552_v9 = vld [vmem:[#allocation7 + $0x8] sm:$0xff]   ;;  %v1553_v10 = vld [vmem:[#allocation9 + $0x8] sm:$0xff]   ;;  %v1807_v11 = vmov 0.0   ;;  %v1554_v12 = vld [vmem:[#allocation7] sm:$0xff]   ;;  %vm1808_vm1 = vmmov 0  }
  0x69   : > { %401 = vadd.xlane.f32.xlu0 %v400_v2  ;;  %1359 = vmatprep.subr.bf16.mxu0 %v1807_v11  ;;  %v1555_v13 = vld [vmem:[#allocation9] sm:$0xff]   ;;  %v1304_v18 = vld [vmem:[%s2178_s1] ss:$0 sm:$0xff]  ;;  %vm429_vm2 = vcmask 257024   ;;  %v1556_v24 = vld [vmem:[#allocation10 + $0x8] sm:$0xff]   ;;  %vm623_vm3 = vcmask 64512  }
  0x6a   : > { %439 = vst.msk [vmem:[#allocation3] sm:$0xff] %vm399_vm0, %v438_v3  ;;  %1367 = vmatprep.subr.bf16.mxu1 %v1807_v11  ;;  %1360 = vmatpush3.bf16.msra.mxu0 %v1552_v9  ;;  %v1305_v20 = vld [vmem:[%s2179_s2] ss:$0 sm:$0xff]  ;;  %s1809_s25 = smov 112   ;;  %s1810_s20 = smov 120   ;;  %vm685_vm4 = vcmask 1043456  }
  0x6b   : > { %1368 = vmatpush3.bf16.msra.mxu1 %v1553_v10  ;;  %1361 = vmatprep.subr.bf16.mxu0 %v1807_v11  ;;  %v1557_v26 = vld [vmem:[#allocation10] sm:$0xff]   ;;  %s1811_s26 = smov 104   ;;  %s1812_s22 = smov 8   ;;  %vm1075_vm5 = vcmask 130048   ;;  %vm1077_vm6 = vcmask 195584  }
  0x6c   : > { %1369 = vmatprep.subr.bf16.mxu1 %v1807_v11  ;;  %1363 = vmatprep.mubr.msk.bf16.mxu0 %vm1808_vm1, %v1807_v11  ;;  %s1813_s16 = smov 16   ;;  %s1814_s17 = smov 24  }
  0x6d   : > { %1371 = vmatprep.mubr.msk.bf16.mxu1 %vm1808_vm1, %v1807_v11  ;;  %s1328_s11 = sshll.u32 %s1790_s30, 7  ;;  %s390_s15 = scalar_lea.vmem [#allocation13], %s1298_s6 }
  0x6e   : > { %1362 = vmatpush3.bf16.msra.mxu0 %v1554_v12  ;;  %s1163_s14 = sshll.u32 %s390_s15, 4  ;;  %s2134_s12 = scalar_lea.hbm %s2185_s8, %s1328_s11  ;;  %s1164_s14 = int_to_ptr.vmem [resolvable:$true] %s1163_s14 }
  0x6f   : > { %1370 = vmatpush3.bf16.msra.mxu1 %v1555_v13  ;;  %1375 = vmatprep.subr.bf16.mxu0 %v1807_v11  ;;  %s1150_s13 = scalar_lea.sflag [#allocation6], %s2013_s3  ;;  %s1710_s23 = scalar_lea.vmem %s1164_s14, 128 }
  0x70   : > { %1383 = vmatprep.subr.bf16.mxu1 %v1807_v11  ;;  %p1711_p1 = scmp.ne.s32.totalorder %s1164_s14, %s1710_s23  ;;  %s1815_s24 = smov [#allocation13]  }
  0x71   : > { %s1714_s30 = sshll.u32 %s1815_s24, 4  ;;  %s1715_s30 = int_to_ptr.vmem [resolvable:$false] %s1714_s30 }
  0x72   : > { %p1712_p3 = pnand %p1711_p1, %p1983_p2  ;;  %s1716_s6 = scalar_lea.vmem %s1715_s30, 256 }
  0x73   : > { %p1717_p0 = scmp.lt.s32.totalorder %s1164_s14, %s1715_s30  ;;  %p1718_p8 = scmp.lt.s32.totalorder %s1716_s6, %s1710_s23 }
  0x74   : > { %p1713_p5 = pneg %p1712_p3 }
  0x75   : > { %p1719_p7 = por %p1718_p8, %p1717_p0 }
  0x77   : > { %p1720_p9 = pnand %p1719_p7, %p1713_p5 }
  0xf2   : > { %v402_v4 = vpop.xlane.xlu0 %401 }
  0xf3   : > { %v404_v5 = vmul.f32 0.03125, %v402_v4 }
  0xf5   : > { %v405_v6 = vsub.f32 %v396_v0, %v404_v5 }
  0xf7   : > { %v406_v7 = vmul.f32 %v405_v6, %v405_v6 }
  0xf9   : > { %v407_v8 = vsel %vm399_vm0, %v406_v7, 0.0 }
  0xfa   : > { %408 = vadd.xlane.f32.xlu0 %v407_v8 }
 0x183   : > { %v409_v14 = vpop.xlane.xlu0 %408 }
 0x184   : > { %v410_v15 = vmul.f32 0.03125, %v409_v14 }
 0x186   : > { %v411_v16 = vadd.f32 1e-05, %v410_v15 }
 0x188   : > { %1560 = vrsqrt.f32 %v411_v16 }
 0x195   : > { %v1561_v17 = vpop.eup %1560 }
 0x196   : > { %v413_v19 = vmul.f32 %v1561_v17, %v405_v6 }
 0x198   : > { %v420_v21 = vmul.f32 %v1304_v18, %v413_v19 }
 0x19a   : > { %v427_v22 = vadd.f32 %v1305_v20, %v420_v21 }
 0x19c   : > { %v428_v23 = vpack.c.bf16 %v427_v22, %v427_v22 }
 0x19e   : > { %430 = vst.msk [vmem:[#allocation2] sm:$0xf] %vm429_vm2, %v428_v23 }
 0x1a5   : > { %v440_v25 = vld [vmem:[#allocation2] sm:$0xf] }
 0x1a6   : > { %1364 = vmatmul.mubr.msk.bf16.vlgmr.msra.gmra.mxu0 %vm399_vm0, %v440_v25  ;;  %1372 = vmatmul.mubr.msk.bf16.vlgmr.msra.gmra.mxu1 %vm399_vm0, %v440_v25 }
 0x1a7   : > { %1376 = vmatpush3.bf16.msra.mxu0 %v1556_v24  ;;  %1379 = vmatprep.mubr.msk.bf16.mxu0 %vm1808_vm1, %v1807_v11 }
 0x1a8   : > { %1377 = vmatprep.subr.bf16.mxu0 %v1807_v11  ;;  %1385 = vmatprep.mubr.msk.bf16.mxu1 %vm1808_vm1, %v1807_v11 }
 0x1ab   : > { %1378 = vmatpush3.bf16.msra.mxu0 %v1557_v26 }
 0x1ac   : > { %1389 = vmatprep.subr.bf16.mxu0 %v1807_v11 }
 0x1ae   : > { %1380 = vmatmul.mubr.msk.bf16.vlgmr.msra.gmra.mxu0 %vm399_vm0, %v440_v25 }
 0x1af   : > { %1391 = vmatprep.mubr.msk.bf16.mxu0 %vm1808_vm1, %v1807_v11 }
 0x266   : > { %v498_v27 = vpop.f32.mrf.mxu0  ;;  %v557_v28 = vpop.f32.mrf.mxu1 }
 0x267   : > { %v563_v29 = vpack.c.bf16 %v557_v28, %v557_v28  ;;  %v504_v35 = vpack.c.bf16 %v498_v27, %v498_v27 }
 0x268   : > { %v1365_v30 = vpop.f32.mrf.mxu0  ;;  %v1373_v31 = vpop.f32.mrf.mxu1 }
 0x269   : > { %844 = vrot.lane.b32.xlu0 %v563_v29, %s1809_s25  ;;  %733 = vrot.lane.b32.xlu1 %v563_v29, %s1810_s20  ;;  %v628_v32 = vsel %vm623_vm3, %v563_v29, 0 }
 0x26a   : > { %v501_v33 = vpop.f32.mrf.mxu0  ;;  %v560_v34 = vpop.f32.mrf.mxu1  ;;  %1384 = vmatpush3.bf16.xpose.msra.mxu1 %v628_v32 }
 0x26b   : > { %1395 = vmatprep.subr.bf16.mxu1 %v1807_v11 }
 0x26c   : > { %v1366_v36 = vpop.f32.mrf.mxu0  ;;  %v1374_v37 = vpop.f32.mrf.mxu1 }
 0x26d   : > { %730 = vrot.lane.b32.xlu1 %v504_v35, %s1810_s20 }
 0x26e   : > { %v616_v38 = vpop.f32.mrf.mxu0 }
 0x26f   : > { %v2069_v39 = vpack.c.bf16 %v616_v38, %v616_v38 }
 0x270   : > { %v1381_v40 = vpop.f32.mrf.mxu0 }
 0x271   : > { %842 = vrot.lane.b32.xlu1 %v504_v35, %s1809_s25  ;;  %1386 = vmatmul.mubr.msk.bf16.vlgmr.msra.gmra.mxu1 %vm623_vm3, %v504_v35  ;;  %v687_v41 = vsel %vm685_vm4, %v2069_v39, 0 }
 0x272   : > { %v619_v42 = vpop.f32.mrf.mxu0  ;;  %1390 = vmatpush3.bf16.msra.mxu0 %v687_v41  ;;  %1397 = vmatprep.mubr.msk.bf16.mxu1 %vm1808_vm1, %v1807_v11 }
 0x273   : > { %1401 = vmatprep.subr.bf16.mxu0 %v1807_v11 }
 0x274   : > { %v1382_v43 = vpop.f32.mrf.mxu0 }
 0x275   : > { %954 = vrot.lane.b32.xlu1 %v563_v29, %s1811_s26 }
 0x279   : > { %952 = vrot.lane.b32.xlu1 %v504_v35, %s1811_s26 }
 0x2db   : > { %v734_v44 = vpop.permute.xlu1 %733  ;;  %v845_v47 = vpop.permute.xlu0 %844 }
 0x2dc   : > { %v739_v45 = vsel %vm623_vm3, %v734_v44, 0  ;;  %v850_v49 = vsel %vm623_vm3, %v845_v47, 0 }
 0x2dd   : > { %1396 = vmatpush3.bf16.xpose.msra.mxu1 %v739_v45 }
 0x2de   : > { %1407 = vmatprep.subr.bf16.mxu1 %v1807_v11 }
 0x2df   : > { %v731_v46 = vpop.permute.xlu1 %730 }
 0x2e3   : > { %v843_v48 = vpop.permute.xlu1 %842 }
 0x2e4   : > { %1398 = vmatmul.mubr.msk.bf16.vlgmr.msra.gmra.mxu1 %vm623_vm3, %v731_v46 }
 0x2e5   : > { %1408 = vmatpush3.bf16.xpose.msra.mxu1 %v850_v49  ;;  %1409 = vmatprep.mubr.msk.bf16.mxu1 %vm1808_vm1, %v1807_v11 }
 0x2e6   : > { %1419 = vmatprep.subr.bf16.mxu1 %v1807_v11 }
 0x2e7   : > { %v955_v50 = vpop.permute.xlu1 %954 }
 0x2e8   : > { %v960_v51 = vsel %vm623_vm3, %v955_v50, 0 }
 0x2eb   : > { %v953_v52 = vpop.permute.xlu1 %952 }
 0x2ec   : > { %1410 = vmatmul.mubr.msk.bf16.vlgmr.msra.gmra.mxu1 %vm623_vm3, %v843_v48 }
 0x2ed   : > { %1420 = vmatpush3.bf16.xpose.msra.mxu1 %v960_v51  ;;  %1421 = vmatprep.mubr.msk.bf16.mxu1 %vm1808_vm1, %v1807_v11 }
 0x2ee   : > { %1431 = vmatprep.subr.bf16.mxu1 %v1807_v11 }
 0x2f4   : > { %1422 = vmatmul.mubr.msk.bf16.vlgmr.msra.gmra.mxu1 %vm623_vm3, %v953_v52 }
 0x2f5   : > { %1435 = vmatprep.mubr.msk.bf16.mxu1 %vm1808_vm1, %v1807_v11 }
 0x331   : > { %v664_v53 = vpop.f32.mrf.mxu1 }
 0x332   : > { %v670_v54 = vsel %vm623_vm3, %v664_v53, -inf }
 0x333   : > { %671 = vmax.xlane.f32.xlu1 %v670_v54  ;;  %v1387_v55 = vpop.f32.mrf.mxu1 }
 0x335   : > { %v667_v56 = vpop.f32.mrf.mxu1 }
 0x336   : > { %v1558_v56 = vld [vmem:[#allocation12 + $0x8] sm:$0xff]  }
 0x337   : > { %v1388_v57 = vpop.f32.mrf.mxu1  ;;  %1432 = vmatpush3.bf16.msra.mxu1 %v1558_v56 }
 0x338   : > { %1433 = vmatprep.subr.bf16.mxu1 %v1807_v11 }
 0x3a4   : > { %v775_v58 = vpop.f32.mrf.mxu1 }
 0x3a5   : > { %v781_v59 = vsel %vm623_vm3, %v775_v58, -inf }
 0x3a6   : > { %782 = vmax.xlane.f32.xlu0 %v781_v59  ;;  %v1399_v60 = vpop.f32.mrf.mxu1 }
 0x3a8   : > { %v778_v61 = vpop.f32.mrf.mxu1 }
 0x3aa   : > { %v1400_v62 = vpop.f32.mrf.mxu1 }
 0x3ac   : > { %v886_v63 = vpop.f32.mrf.mxu1 }
 0x3ad   : > { %v892_v0 = vsel %vm623_vm3, %v886_v63, -inf }
 0x3ae   : > { %893 = vmax.xlane.f32.xlu1 %v892_v0  ;;  %v1411_v1 = vpop.f32.mrf.mxu1 }
 0x3af   : > { %v1559_v1 = vld [vmem:[#allocation12] sm:$0xff]  }
 0x3b0   : > { %v889_v2 = vpop.f32.mrf.mxu1  ;;  %1434 = vmatpush3.bf16.msra.mxu1 %v1559_v1 }
 0x3b2   : > { %v1412_v3 = vpop.f32.mrf.mxu1 }
 0x3b4   : > { %v996_v4 = vpop.f32.mrf.mxu1 }
 0x3b5   : > { %v1002_v5 = vsel %vm623_vm3, %v996_v4, -inf }
 0x3b6   : > { %1003 = vmax.xlane.f32.xlu1 %v1002_v5  ;;  %v1423_v6 = vpop.f32.mrf.mxu1 }
 0x3b8   : > { %v999_v7 = vpop.f32.mrf.mxu1 }
 0x3ba   : > { %v1424_v8 = vpop.f32.mrf.mxu1 }
 0x3bc   : > { %v672_v9 = vpop.xlane.xlu1 %671 }
 0x3bd   : > { %v673_v10 = vsub.f32 %v664_v53, %v672_v9 }
 0x3bf   : > { %v674_v12 = vmul.f32 1.442695, %v673_v10 }
 0x3c1   : > { %1562 = vpow2.f32 %v674_v12 }
 0x3ce   : > { %v1563_v13 = vpop.eup %1562 }
 0x3cf   : > { %v676_v14 = vsel %vm623_vm3, %v1563_v13, 0.0 }
 0x3d0   : > { %677 = vadd.xlane.f32.xlu0 %v676_v14 }
 0x42f   : > { %v783_v15 = vpop.xlane.xlu0 %782 }
 0x430   : > { %v784_v16 = vsub.f32 %v775_v58, %v783_v15 }
 0x432   : > { %v785_v17 = vmul.f32 1.442695, %v784_v16 }
 0x434   : > { %1564 = vpow2.f32 %v785_v17 }
 0x437   : > { %v894_v18 = vpop.xlane.xlu1 %893 }
 0x438   : > { %v895_v19 = vsub.f32 %v886_v63, %v894_v18 }
 0x43a   : > { %v896_v20 = vmul.f32 1.442695, %v895_v19 }
 0x43c   : > { %1566 = vpow2.f32 %v896_v20 }
 0x43f   : > { %v1004_v26 = vpop.xlane.xlu1 %1003 }
 0x440   : > { %v1005_v27 = vsub.f32 %v996_v4, %v1004_v26 }
 0x441   : > { %v1565_v21 = vpop.eup %1564 }
 0x442   : > { %v787_v22 = vsel %vm623_vm3, %v1565_v21, 0.0  ;;  %v1006_v28 = vmul.f32 1.442695, %v1005_v27 }
 0x443   : > { %788 = vadd.xlane.f32.xlu1 %v787_v22 }
 0x449   : > { %v1567_v23 = vpop.eup %1566 }
 0x44a   : > { %v898_v24 = vsel %vm623_vm3, %v1567_v23, 0.0 }
 0x44b   : > { %899 = vadd.xlane.f32.xlu0 %v898_v24 }
 0x454   : > { %904 = vrot.lane.b32.xlu1 %v2069_v39, %s1809_s25 }
 0x459   : > { %v678_v25 = vpop.xlane.xlu0 %677 }
 0x45a   : > { %1568 = vrcp.f32 %v678_v25 }
 0x45b   : > { %1570 = vpow2.f32 %v1006_v28 }
 0x461   : > { %794 = vrot.lane.b32.xlu0 %v2069_v39, %s1810_s20 }
 0x467   : > { %v1569_v29 = vpop.eup %1568 }
 0x468   : > { %v680_v30 = vmul.f32 %v1569_v29, %v1563_v13  ;;  %v1571_v32 = vpop.eup %1570  ;;  %v1080_v13 = vld [vmem:[#allocation3] sm:$0xff] }
 0x469   : > { %v1008_v33 = vsel %vm623_vm3, %v1571_v32, 0.0 }
 0x46a   : > { %v681_v31 = vpack.c.bf16 %v680_v30, %v680_v30 }
 0x46c   : > { %1392 = vmatmul.mubr.msk.bf16.vlgmr.msra.gmra.mxu0 %vm623_vm3, %v681_v31 }
 0x46d   : > { %1403 = vmatprep.mubr.msk.bf16.mxu0 %vm1808_vm1, %v1807_v11 }
 0x478   : > { %1009 = vadd.xlane.f32.xlu1 %v1008_v33 }
 0x489   : > { %1014 = vrot.lane.b32.xlu1 %v2069_v39, %s1811_s26 }
 0x4cc   : > { %v789_v34 = vpop.xlane.xlu1 %788 }
 0x4cd   : > { %1572 = vrcp.f32 %v789_v34 }
 0x4d0   : > { %v905_v41 = vpop.permute.xlu1 %904 }
 0x4d1   : > { %v910_v43 = vsel %vm685_vm4, %v905_v41, 0 }
 0x4d4   : > { %v900_v35 = vpop.xlane.xlu0 %899 }
 0x4d5   : > { %1574 = vrcp.f32 %v900_v35 }
 0x4d8   : > { %v795_v36 = vpop.permute.xlu0 %794 }
 0x4d9   : > { %v800_v37 = vsel %vm685_vm4, %v795_v36, 0 }
 0x4da   : > { %v1573_v38 = vpop.eup %1572  ;;  %1402 = vmatpush3.bf16.msra.mxu0 %v800_v37 }
 0x4db   : > { %1413 = vmatprep.subr.bf16.mxu0 %v1807_v11  ;;  %v791_v40 = vmul.f32 %v1573_v38, %v1565_v21 }
 0x4dd   : > { %v792_v42 = vpack.c.bf16 %v791_v40, %v791_v40 }
 0x4df   : > { %1404 = vmatmul.mubr.msk.bf16.vlgmr.msra.gmra.mxu0 %vm623_vm3, %v792_v42 }
 0x4e0   : > { %1414 = vmatpush3.bf16.msra.mxu0 %v910_v43  ;;  %1415 = vmatprep.mubr.msk.bf16.mxu0 %vm1808_vm1, %v1807_v11 }
 0x4e1   : > { %1425 = vmatprep.subr.bf16.mxu0 %v1807_v11 }
 0x4e2   : > { %v1575_v39 = vpop.eup %1574 }
 0x4e3   : > { %v902_v44 = vmul.f32 %v1575_v39, %v1567_v23 }
 0x4e5   : > { %v903_v45 = vpack.c.bf16 %v902_v44, %v902_v44 }
 0x4e7   : > { %1416 = vmatmul.mubr.msk.bf16.vlgmr.msra.gmra.mxu0 %vm623_vm3, %v903_v45 }
 0x4e8   : > { %1427 = vmatprep.mubr.msk.bf16.mxu0 %vm1808_vm1, %v1807_v11 }
 0x501   : > { %v1010_v46 = vpop.xlane.xlu1 %1009 }
 0x502   : > { %1576 = vrcp.f32 %v1010_v46 }
 0x505   : > { %v1015_v47 = vpop.permute.xlu1 %1014 }
 0x506   : > { %v1020_v48 = vsel %vm685_vm4, %v1015_v47, 0 }
 0x507   : > { %1426 = vmatpush3.bf16.msra.mxu0 %v1020_v48 }
 0x50f   : > { %v1577_v49 = vpop.eup %1576 }
 0x510   : > { %v1012_v50 = vmul.f32 %v1577_v49, %v1571_v32 }
 0x512   : > { %v1013_v51 = vpack.c.bf16 %v1012_v50, %v1012_v50 }
 0x514   : > { %1428 = vmatmul.mubr.msk.bf16.vlgmr.msra.gmra.mxu0 %vm623_vm3, %v1013_v51 }
 0x52c   : > { %v723_v52 = vpop.f32.mrf.mxu0 }
 0x52e   : > { %v1393_v53 = vpop.f32.mrf.mxu0 }
 0x530   : > { %v726_v54 = vpop.f32.mrf.mxu0 }
 0x532   : > { %v1394_v55 = vpop.f32.mrf.mxu0 }
 0x59f   : > { %v836_v57 = vpop.f32.mrf.mxu0 }
 0x5a0   : > { %1063 = vrot.lane.b32.xlu0 %v836_v57, %s1812_s22 }
 0x5a1   : > { %v1405_v58 = vpop.f32.mrf.mxu0 }
 0x5a3   : > { %v839_v59 = vpop.f32.mrf.mxu0 }
 0x5a5   : > { %v1406_v60 = vpop.f32.mrf.mxu0 }
 0x5a7   : > { %v946_v61 = vpop.f32.mrf.mxu0 }
 0x5a8   : > { %1067 = vrot.lane.b32.xlu1 %v946_v61, %s1813_s16 }
 0x5a9   : > { %v1417_v62 = vpop.f32.mrf.mxu0 }
 0x5ab   : > { %v949_v63 = vpop.f32.mrf.mxu0 }
 0x5ad   : > { %v1418_v0 = vpop.f32.mrf.mxu0 }
 0x5d4   : > { %v1056_v2 = vpop.f32.mrf.mxu0 }
 0x5d5   : > { %1071 = vrot.lane.b32.xlu0 %v1056_v2, %s1814_s17 }
 0x5d6   : > { %v1429_v3 = vpop.f32.mrf.mxu0 }
 0x5d8   : > { %v1059_v4 = vpop.f32.mrf.mxu0 }
 0x5da   : > { %v1430_v11 = vpop.f32.mrf.mxu0 }
 0x612   : > { %v1064_v5 = vpop.permute.xlu0 %1063 }
 0x613   : > { %v1074_v7 = vsel %vm623_vm3, %v723_v52, %v1064_v5 }
 0x61a   : > { %v1068_v6 = vpop.permute.xlu1 %1067 }
 0x61b   : > { %v1076_v8 = vsel %vm1075_vm5, %v1074_v7, %v1068_v6 }
 0x647   : > { %v1072_v9 = vpop.permute.xlu0 %1071 }
 0x648   : > { %v1078_v10 = vsel %vm1077_vm6, %v1076_v8, %v1072_v9 }
 0x649   : > { %v1079_v12 = vpack.c.bf16 %v1078_v10, %v1078_v10 }
 0x64b   : > { %1436 = vmatmul.mubr.msk.bf16.vlgmr.msra.gmra.mxu1 %vm399_vm0, %v1079_v12 }
 0x70b   : > { %v1136_v14 = vpop.f32.mrf.mxu1 }
 0x70c   : > { %v1142_v15 = vadd.f32 %v1136_v14, %v1080_v13 }
 0x70d   : > { %v1437_v16 = vpop.f32.mrf.mxu1 }
 0x70e   : > { %1143 = vst.msk [vmem:[#allocation3] sm:$0xff] %vm399_vm0, %v1142_v15 }
 0x70f   : > { %v1139_v17 = vpop.f32.mrf.mxu1 }
 0x711   : > { %v1438_v18 = vpop.f32.mrf.mxu1 }
 0x715   : > { %v1147_v19 = vld [vmem:[#allocation3] sm:$0xff] }
 0x716   : > { %1148 = vst.msk [vmem:[%s390_s15] sm:$0xff] %vm399_vm0, %v1147_v19 }
 0x717   : > { %1723 = shalt.err (!%p1720_p9)
}
 0x718   : > { %s1724_s25 = scalar_lea.hbm %s2134_s12, 128  ;;  %s1728_s26 = scalar_lea.hbm %s2185_s8, 256 }
 0x719   : > { %p1725_p10 = scmp.ne.s32.totalorder %s2134_s12, %s1724_s25  ;;  %p1729_p13 = scmp.lt.s32.totalorder %s2134_s12, %s2185_s8 }
 0x71a   : > { %p1730_p4 = scmp.lt.s32.totalorder %s1728_s26, %s1724_s25 }
 0x71b   : > { %p1726_p12 = pnand %p1725_p10, %p1983_p2 }
 0x71c   : > { %p1731_p11 = por %p1730_p4, %p1729_p13 }
 0x71d   : > { %p1727_p6 = pneg %p1726_p12 }
 0x71f   : > { %p1732_p1 = pnand %p1731_p11, %p1727_p6 }
 0x721   : > { %1735 = shalt.err (!%p1732_p1)
}
 0x722   : > { %1457 = dma.vmem_to_hbm [thread:$0]  (%p1983_p2), %s1164_s14, 128, %s2134_s12, %s1150_s13  }
 0x723 PF: > { %s1175_s17 = sand.u32 1, %s1778_s27   ;;  %p2204_p3 = scmp.ne.s32.totalorder %s2202_s18, 0 }
 0x724   : > { %p2205_p5 = scmp.ge.s32.totalorder %s1798_s10, 2  ;;  %s1176_s11 = scalar_lea.sflag [#allocation6], %s1175_s17 }
 0x726   : > { %p1477_p0 = pnand %p2205_p5, %p2204_p3 }
 0x728   : > { %p1478_p8 = pneg %p1477_p0 }
 0x72a   : > { %1773 = dma.done.wait (%p1478_p8), %s1176_s11, 128  }
 0x72b   : > { %1775 = vsyncadd (%p1478_p8), %s1176_s11, 4294967168  ;;  %s26_s10 = sadd.s32 1, %s1798_s10   ;;  %s2206_s19 = sld [smem:[#allocation18_spill]] }
 0x72c   : > { %p23_p7 = scmp.ge.s32.totalorder %s26_s10, 4   ;;  %s2207_s27 = smov %s1782_s28 }
 0x72d   : > { %s2208_s28 = smov %s1786_s29  ;;  %s2209_s29 = smov %s1988_s21 }
 0x72e   : > { %s2210_s30 = smov %s1794_s9  ;;  %25 = sbr.rel (!%p23_p7) target bundleno = 13 (0xd), region = 125 }
 0x731   : > { %s2211_s9 = smov %s2206_s19 }
 0x733   :  { %1181 = vsyncpa [#allocation5], 1 }
 0x734   :  { %1183 = vsyncpa [#allocation5 + $0x1], 1 }
 0x735   :  { %1184 = vsyncpa [#allocation8], 1 }
 0x736   :  { %1185 = vsyncpa [#allocation11], 1 }
 0x737   :  { %1186 = vsyncpa [#allocation6], 1 }
 0x738   :  { %1188 = vsyncpa [#allocation6 + $0x1], 1 }

</bundles_post_ra>
